<compile_context>
chip_gen: v6e
topology: v6e:2x2x1
jax: 0.10.0
libtpu: 0.0.40
codegen_flags: <defaults>
</compile_context>

<pallas_src>
import functools

import jax
import jax.numpy as jnp
from jax.experimental import pallas as pl
from jax.experimental.pallas import tpu as pltpu


def _dilated_conv_kernel(x_ref, w_ref, o_ref, *, n_taps):
    # x_ref: (1, n_taps, t_tile, FCp)  per-tap unfolded input (lane-dense)
    # w_ref: (n_taps, FCp)             per-tap weights, tiled along the F axis
    # o_ref: (1, t_tile, FCp)
    acc = jnp.zeros(o_ref.shape[1:], jnp.float32)
    # Small static loop over taps: each iteration is one dense VPU FMA on a
    # (t_tile, FCp) tile (the 1-row weight is a cheap sublane broadcast).
    # No MXU, no cross-lane relayouts, f32 accumulation.
    for k in range(n_taps):
        acc = acc + (x_ref[0, k] * w_ref[k:k + 1, :]).astype(jnp.float32)
    o_ref[0] = acc.astype(o_ref.dtype)


def _pick_t_tile(t_out, cap=128):
    """Largest multiple-of-8 tile dividing t_out that still gives >=2 tiles."""
    if t_out % 8 != 0:
        return t_out                      # full-dim block is always legal
    tile = 8
    for cand in range(8, min(cap, t_out) + 1, 8):
        if t_out % cand == 0 and t_out // cand >= 2:
            tile = cand
    return tile


def dilated_conv_pallas(x_nchw, weight_oihw, *, twidth, fwidth, dilation):
    """Forward pass of DilatedConv.  x_nchw: (B, C_in, T, F), weight OIHW."""
    pad_length1 = 1 * (fwidth - 1)
    pad_length2 = dilation * (twidth - 1)
    if twidth % 2 == 1 and fwidth % 2 == 1:
        # ConstantPad2d((l, r, top, bot)) on (..., T, F)
        pad_f = (pad_length1 // 2, pad_length1 // 2)
        pad_t = (pad_length2 // 2, pad_length2 // 2)
    elif twidth % 2 == 0 and fwidth % 2 == 0:
        pad_f = (pad_length1, 0)
        pad_t = (pad_length2, 0)
    else:
        raise ValueError("twidth/fwidth parity combination has no pad defined "
                         "in the reference module")

    B, C_in, T, F = x_nchw.shape
    C_out = weight_oihw.shape[0]

    x_pad = jnp.pad(x_nchw, ((0, 0), (0, 0), pad_t, pad_f))
    T_pad = T + pad_t[0] + pad_t[1]
    F_pad = F + pad_f[0] + pad_f[1]
    T_out = T_pad - dilation * (twidth - 1)
    F_out = F_pad - (fwidth - 1)

    n_taps = twidth * fwidth * C_in
    FC = F_out * C_out
    FCp = ((FC + 127) // 128) * 128       # lane-dense last dim (multiple of 128)

    # ---- wrapper-side layout plumbing (plain-JAX glue) ----------------------
    # Tap unfold: xcol[b, k, t, f] = x_pad[b, c, t + it*dil, f + jf]
    # with flat tap index k = (it*fwidth + jf)*C_in + c.
    taps = []
    for it in range(twidth):
        for jf in range(fwidth):
            taps.append(x_pad[:, :,
                              it * dilation:it * dilation + T_out,
                              jf:jf + F_out])
    xcol = jnp.stack(taps, axis=1)                         # (B, tw*fw, C_in, T_out, F_out)
    xcol = xcol.reshape(B, n_taps, T_out, F_out)
    # Replicate each input value across the C_out sub-lanes: lane = f*C_out + o.
    xcol = jnp.broadcast_to(xcol[..., None], (B, n_taps, T_out, F_out, C_out))
    xcol = xcol.reshape(B, n_taps, T_out, FC)
    if FCp != FC:
        xcol = jnp.pad(xcol, ((0, 0), (0, 0), (0, 0), (0, FCp - FC)))

    # Weights: wrow[k, f*C_out + o] = weight[o, c, it, jf]  (tiled along F).
    w_k = jnp.transpose(weight_oihw, (2, 3, 1, 0)).reshape(n_taps, C_out)
    wrow = jnp.broadcast_to(w_k[:, None, :], (n_taps, F_out, C_out)).reshape(n_taps, FC)
    if FCp != FC:
        wrow = jnp.pad(wrow, ((0, 0), (0, FCp - FC)))
    wrow = wrow.astype(x_nchw.dtype)

    # ---- Pallas call --------------------------------------------------------
    t_tile = _pick_t_tile(T_out)
    n_t = T_out // t_tile

    kernel = functools.partial(_dilated_conv_kernel, n_taps=n_taps)

    flops = 2 * B * T_out * F_out * twidth * fwidth * C_in * C_out
    bytes_accessed = int(xcol.size) * xcol.dtype.itemsize \
        + int(wrow.size) * wrow.dtype.itemsize \
        + B * T_out * FCp * jnp.dtype(x_nchw.dtype).itemsize

    out_lane = pl.pallas_call(
        kernel,
        out_shape=jax.ShapeDtypeStruct((B, T_out, FCp), x_nchw.dtype),
        grid_spec=pltpu.PrefetchScalarGridSpec(
            num_scalar_prefetch=0,
            grid=(B, n_t),
            in_specs=[
                pl.BlockSpec((1, n_taps, t_tile, FCp),
                             lambda b, t: (b, 0, t, 0)),
                pl.BlockSpec((n_taps, FCp), lambda b, t: (0, 0)),
            ],
            out_specs=pl.BlockSpec((1, t_tile, FCp), lambda b, t: (b, t, 0)),
        ),
        compiler_params=pltpu.CompilerParams(
            dimension_semantics=("parallel", "parallel")),
        cost_estimate=pl.CostEstimate(
            flops=flops, transcendentals=0, bytes_accessed=bytes_accessed),
    )(xcol, wrow)

    # Unpack lane-dense (T, F*C_out) back to NCHW so the output matches PyTorch.
    out = out_lane[..., :FC].reshape(B, T_out, F_out, C_out)
    return jnp.transpose(out, (0, 3, 1, 2))


def _reference(x_nchw, weight_oihw, *, twidth, fwidth, dilation):
    """Pure-JAX reference mirroring the PyTorch module (pad + dilated conv)."""
    pad_length1 = 1 * (fwidth - 1)
    pad_length2 = dilation * (twidth - 1)
    if twidth % 2 == 1 and fwidth % 2 == 1:
        pad_f = (pad_length1 // 2, pad_length1 // 2)
        pad_t = (pad_length2 // 2, pad_length2 // 2)
    else:
        pad_f = (pad_length1, 0)
        pad_t = (pad_length2, 0)
    x_pad = jnp.pad(x_nchw, ((0, 0), (0, 0), pad_t, pad_f))
    return jax.lax.conv_general_dilated(
        x_pad, weight_oihw,
        window_strides=(1, 1),
        padding="VALID",
        rhs_dilation=(dilation, 1),
        dimension_numbers=("NCHW", "OIHW", "NCHW"),
    )


if __name__ == "__main__":
    # Module hyper-parameters (odd/odd branch of the padding).
    middle_channel, out_channel = 4, 8
    twidth, fwidth, dilation = 3, 3, 2

    key = jax.random.PRNGKey(0)
    kx, kw = jax.random.split(key)

    # Input: NCHW = (batch, middle_channel, time, freq)
    x = jax.random.normal(kx, (2, middle_channel, 16, 16), dtype=jnp.float32)
    # Conv2d weight, OIHW, bias=False.
    w = jax.random.normal(
        kw, (out_channel, middle_channel, twidth, fwidth), dtype=jnp.float32
    ) * 0.1

    out = dilated_conv_pallas(x, w, twidth=twidth, fwidth=fwidth,
                              dilation=dilation)
    out = jax.block_until_ready(out)

    ref = _reference(x, w, twidth=twidth, fwidth=fwidth, dilation=dilation)
    assert out.shape == ref.shape, (out.shape, ref.shape)
    assert jnp.allclose(out, ref, atol=1e-4, rtol=1e-4), "mismatch vs reference"

    print("KERNEL_OK")
</pallas_src>

<mosaic_0001>
module attributes {stable_mosaic.version = 11 : i64} {
  func.func @_dilated_conv_kernel(%arg0: i32, %arg1: i32, %arg2: memref<1x36x8x128xf32, #tpu.memory_space<vmem>>, %arg3: memref<36x128xf32, #tpu.memory_space<vmem>>, %arg4: memref<1x8x128xf32, #tpu.memory_space<vmem>>) attributes {dimension_semantics = [#tpu.dimension_semantics<parallel>, #tpu.dimension_semantics<parallel>], iteration_bounds = array<i64: 2, 2>, scalar_prefetch = 0 : i64, scratch_operands = 0 : i64, tpu.core_type = #tpu.core_type<tc>, window_params = [{transform_indices = @transform_0, window_bounds = array<i64: 1, 36, 8, 128>}, {pipeline_mode = #tpu.pipeline_mode<synchronous>, transform_indices = @transform_1, window_bounds = array<i64: 36, 128>}, {transform_indices = @transform_2, window_bounds = array<i64: 1, 8, 128>}]} {
    %cst = arith.constant 0.000000e+00 : f32
    %0 = vector.broadcast %cst : f32 to vector<8x128xf32>
    %c0 = arith.constant 0 : index
    %c0_0 = arith.constant 0 : index
    %c0_1 = arith.constant 0 : index
    %c0_2 = arith.constant 0 : index
    %1 = vector.load %arg2[%c0, %c0_0, %c0_1, %c0_2] : memref<1x36x8x128xf32, #tpu.memory_space<vmem>>, vector<1x1x8x128xf32>
    %2 = vector.shape_cast %1 : vector<1x1x8x128xf32> to vector<8x128xf32>
    %c0_3 = arith.constant 0 : index
    %c0_4 = arith.constant 0 : index
    %3 = vector.load %arg3[%c0_3, %c0_4] : memref<36x128xf32, #tpu.memory_space<vmem>>, vector<1x128xf32>
    %4 = vector.broadcast %3 : vector<1x128xf32> to vector<8x128xf32>
    %5 = arith.mulf %2, %4 : vector<8x128xf32>
    %6 = arith.addf %0, %5 : vector<8x128xf32>
    %c0_5 = arith.constant 0 : index
    %c1 = arith.constant 1 : index
    %c0_6 = arith.constant 0 : index
    %c0_7 = arith.constant 0 : index
    %7 = vector.load %arg2[%c0_5, %c1, %c0_6, %c0_7] : memref<1x36x8x128xf32, #tpu.memory_space<vmem>>, vector<1x1x8x128xf32>
    %8 = vector.shape_cast %7 : vector<1x1x8x128xf32> to vector<8x128xf32>
    %c1_8 = arith.constant 1 : index
    %c0_9 = arith.constant 0 : index
    %9 = vector.load %arg3[%c1_8, %c0_9] : memref<36x128xf32, #tpu.memory_space<vmem>>, vector<1x128xf32>
    %10 = vector.broadcast %9 : vector<1x128xf32> to vector<8x128xf32>
    %11 = arith.mulf %8, %10 : vector<8x128xf32>
    %12 = arith.addf %6, %11 : vector<8x128xf32>
    %c0_10 = arith.constant 0 : index
    %c2 = arith.constant 2 : index
    %c0_11 = arith.constant 0 : index
    %c0_12 = arith.constant 0 : index
    %13 = vector.load %arg2[%c0_10, %c2, %c0_11, %c0_12] : memref<1x36x8x128xf32, #tpu.memory_space<vmem>>, vector<1x1x8x128xf32>
    %14 = vector.shape_cast %13 : vector<1x1x8x128xf32> to vector<8x128xf32>
    %c2_13 = arith.constant 2 : index
    %c0_14 = arith.constant 0 : index
    %15 = vector.load %arg3[%c2_13, %c0_14] : memref<36x128xf32, #tpu.memory_space<vmem>>, vector<1x128xf32>
    %16 = vector.broadcast %15 : vector<1x128xf32> to vector<8x128xf32>
    %17 = arith.mulf %14, %16 : vector<8x128xf32>
    %18 = arith.addf %12, %17 : vector<8x128xf32>
    %c0_15 = arith.constant 0 : index
    %c3 = arith.constant 3 : index
    %c0_16 = arith.constant 0 : index
    %c0_17 = arith.constant 0 : index
    %19 = vector.load %arg2[%c0_15, %c3, %c0_16, %c0_17] : memref<1x36x8x128xf32, #tpu.memory_space<vmem>>, vector<1x1x8x128xf32>
    %20 = vector.shape_cast %19 : vector<1x1x8x128xf32> to vector<8x128xf32>
    %c3_18 = arith.constant 3 : index
    %c0_19 = arith.constant 0 : index
    %21 = vector.load %arg3[%c3_18, %c0_19] : memref<36x128xf32, #tpu.memory_space<vmem>>, vector<1x128xf32>
    %22 = vector.broadcast %21 : vector<1x128xf32> to vector<8x128xf32>
    %23 = arith.mulf %20, %22 : vector<8x128xf32>
    %24 = arith.addf %18, %23 : vector<8x128xf32>
    %c0_20 = arith.constant 0 : index
    %c4 = arith.constant 4 : index
    %c0_21 = arith.constant 0 : index
    %c0_22 = arith.constant 0 : index
    %25 = vector.load %arg2[%c0_20, %c4, %c0_21, %c0_22] : memref<1x36x8x128xf32, #tpu.memory_space<vmem>>, vector<1x1x8x128xf32>
    %26 = vector.shape_cast %25 : vector<1x1x8x128xf32> to vector<8x128xf32>
    %c4_23 = arith.constant 4 : index
    %c0_24 = arith.constant 0 : index
    %27 = vector.load %arg3[%c4_23, %c0_24] : memref<36x128xf32, #tpu.memory_space<vmem>>, vector<1x128xf32>
    %28 = vector.broadcast %27 : vector<1x128xf32> to vector<8x128xf32>
    %29 = arith.mulf %26, %28 : vector<8x128xf32>
    %30 = arith.addf %24, %29 : vector<8x128xf32>
    %c0_25 = arith.constant 0 : index
    %c5 = arith.constant 5 : index
    %c0_26 = arith.constant 0 : index
    %c0_27 = arith.constant 0 : index
    %31 = vector.load %arg2[%c0_25, %c5, %c0_26, %c0_27] : memref<1x36x8x128xf32, #tpu.memory_space<vmem>>, vector<1x1x8x128xf32>
    %32 = vector.shape_cast %31 : vector<1x1x8x128xf32> to vector<8x128xf32>
    %c5_28 = arith.constant 5 : index
    %c0_29 = arith.constant 0 : index
    %33 = vector.load %arg3[%c5_28, %c0_29] : memref<36x128xf32, #tpu.memory_space<vmem>>, vector<1x128xf32>
    %34 = vector.broadcast %33 : vector<1x128xf32> to vector<8x128xf32>
    %35 = arith.mulf %32, %34 : vector<8x128xf32>
    %36 = arith.addf %30, %35 : vector<8x128xf32>
    %c0_30 = arith.constant 0 : index
    %c6 = arith.constant 6 : index
    %c0_31 = arith.constant 0 : index
    %c0_32 = arith.constant 0 : index
    %37 = vector.load %arg2[%c0_30, %c6, %c0_31, %c0_32] : memref<1x36x8x128xf32, #tpu.memory_space<vmem>>, vector<1x1x8x128xf32>
    %38 = vector.shape_cast %37 : vector<1x1x8x128xf32> to vector<8x128xf32>
    %c6_33 = arith.constant 6 : index
    %c0_34 = arith.constant 0 : index
    %39 = vector.load %arg3[%c6_33, %c0_34] : memref<36x128xf32, #tpu.memory_space<vmem>>, vector<1x128xf32>
    %40 = vector.broadcast %39 : vector<1x128xf32> to vector<8x128xf32>
    %41 = arith.mulf %38, %40 : vector<8x128xf32>
    %42 = arith.addf %36, %41 : vector<8x128xf32>
    %c0_35 = arith.constant 0 : index
    %c7 = arith.constant 7 : index
    %c0_36 = arith.constant 0 : index
    %c0_37 = arith.constant 0 : index
    %43 = vector.load %arg2[%c0_35, %c7, %c0_36, %c0_37] : memref<1x36x8x128xf32, #tpu.memory_space<vmem>>, vector<1x1x8x128xf32>
    %44 = vector.shape_cast %43 : vector<1x1x8x128xf32> to vector<8x128xf32>
    %c7_38 = arith.constant 7 : index
    %c0_39 = arith.constant 0 : index
    %45 = vector.load %arg3[%c7_38, %c0_39] : memref<36x128xf32, #tpu.memory_space<vmem>>, vector<1x128xf32>
    %46 = vector.broadcast %45 : vector<1x128xf32> to vector<8x128xf32>
    %47 = arith.mulf %44, %46 : vector<8x128xf32>
    %48 = arith.addf %42, %47 : vector<8x128xf32>
    %c0_40 = arith.constant 0 : index
    %c8 = arith.constant 8 : index
    %c0_41 = arith.constant 0 : index
    %c0_42 = arith.constant 0 : index
    %49 = vector.load %arg2[%c0_40, %c8, %c0_41, %c0_42] : memref<1x36x8x128xf32, #tpu.memory_space<vmem>>, vector<1x1x8x128xf32>
    %50 = vector.shape_cast %49 : vector<1x1x8x128xf32> to vector<8x128xf32>
    %c8_43 = arith.constant 8 : index
    %c0_44 = arith.constant 0 : index
    %51 = vector.load %arg3[%c8_43, %c0_44] : memref<36x128xf32, #tpu.memory_space<vmem>>, vector<1x128xf32>
    %52 = vector.broadcast %51 : vector<1x128xf32> to vector<8x128xf32>
    %53 = arith.mulf %50, %52 : vector<8x128xf32>
    %54 = arith.addf %48, %53 : vector<8x128xf32>
    %c0_45 = arith.constant 0 : index
    %c9 = arith.constant 9 : index
    %c0_46 = arith.constant 0 : index
    %c0_47 = arith.constant 0 : index
    %55 = vector.load %arg2[%c0_45, %c9, %c0_46, %c0_47] : memref<1x36x8x128xf32, #tpu.memory_space<vmem>>, vector<1x1x8x128xf32>
    %56 = vector.shape_cast %55 : vector<1x1x8x128xf32> to vector<8x128xf32>
    %c9_48 = arith.constant 9 : index
    %c0_49 = arith.constant 0 : index
    %57 = vector.load %arg3[%c9_48, %c0_49] : memref<36x128xf32, #tpu.memory_space<vmem>>, vector<1x128xf32>
    %58 = vector.broadcast %57 : vector<1x128xf32> to vector<8x128xf32>
    %59 = arith.mulf %56, %58 : vector<8x128xf32>
    %60 = arith.addf %54, %59 : vector<8x128xf32>
    %c0_50 = arith.constant 0 : index
    %c10 = arith.constant 10 : index
    %c0_51 = arith.constant 0 : index
    %c0_52 = arith.constant 0 : index
    %61 = vector.load %arg2[%c0_50, %c10, %c0_51, %c0_52] : memref<1x36x8x128xf32, #tpu.memory_space<vmem>>, vector<1x1x8x128xf32>
    %62 = vector.shape_cast %61 : vector<1x1x8x128xf32> to vector<8x128xf32>
    %c10_53 = arith.constant 10 : index
    %c0_54 = arith.constant 0 : index
    %63 = vector.load %arg3[%c10_53, %c0_54] : memref<36x128xf32, #tpu.memory_space<vmem>>, vector<1x128xf32>
    %64 = vector.broadcast %63 : vector<1x128xf32> to vector<8x128xf32>
    %65 = arith.mulf %62, %64 : vector<8x128xf32>
    %66 = arith.addf %60, %65 : vector<8x128xf32>
    %c0_55 = arith.constant 0 : index
    %c11 = arith.constant 11 : index
    %c0_56 = arith.constant 0 : index
    %c0_57 = arith.constant 0 : index
    %67 = vector.load %arg2[%c0_55, %c11, %c0_56, %c0_57] : memref<1x36x8x128xf32, #tpu.memory_space<vmem>>, vector<1x1x8x128xf32>
    %68 = vector.shape_cast %67 : vector<1x1x8x128xf32> to vector<8x128xf32>
    %c11_58 = arith.constant 11 : index
    %c0_59 = arith.constant 0 : index
    %69 = vector.load %arg3[%c11_58, %c0_59] : memref<36x128xf32, #tpu.memory_space<vmem>>, vector<1x128xf32>
    %70 = vector.broadcast %69 : vector<1x128xf32> to vector<8x128xf32>
    %71 = arith.mulf %68, %70 : vector<8x128xf32>
    %72 = arith.addf %66, %71 : vector<8x128xf32>
    %c0_60 = arith.constant 0 : index
    %c12 = arith.constant 12 : index
    %c0_61 = arith.constant 0 : index
    %c0_62 = arith.constant 0 : index
    %73 = vector.load %arg2[%c0_60, %c12, %c0_61, %c0_62] : memref<1x36x8x128xf32, #tpu.memory_space<vmem>>, vector<1x1x8x128xf32>
    %74 = vector.shape_cast %73 : vector<1x1x8x128xf32> to vector<8x128xf32>
    %c12_63 = arith.constant 12 : index
    %c0_64 = arith.constant 0 : index
    %75 = vector.load %arg3[%c12_63, %c0_64] : memref<36x128xf32, #tpu.memory_space<vmem>>, vector<1x128xf32>
    %76 = vector.broadcast %75 : vector<1x128xf32> to vector<8x128xf32>
    %77 = arith.mulf %74, %76 : vector<8x128xf32>
    %78 = arith.addf %72, %77 : vector<8x128xf32>
    %c0_65 = arith.constant 0 : index
    %c13 = arith.constant 13 : index
    %c0_66 = arith.constant 0 : index
    %c0_67 = arith.constant 0 : index
    %79 = vector.load %arg2[%c0_65, %c13, %c0_66, %c0_67] : memref<1x36x8x128xf32, #tpu.memory_space<vmem>>, vector<1x1x8x128xf32>
    %80 = vector.shape_cast %79 : vector<1x1x8x128xf32> to vector<8x128xf32>
    %c13_68 = arith.constant 13 : index
    %c0_69 = arith.constant 0 : index
    %81 = vector.load %arg3[%c13_68, %c0_69] : memref<36x128xf32, #tpu.memory_space<vmem>>, vector<1x128xf32>
    %82 = vector.broadcast %81 : vector<1x128xf32> to vector<8x128xf32>
    %83 = arith.mulf %80, %82 : vector<8x128xf32>
    %84 = arith.addf %78, %83 : vector<8x128xf32>
    %c0_70 = arith.constant 0 : index
    %c14 = arith.constant 14 : index
    %c0_71 = arith.constant 0 : index
    %c0_72 = arith.constant 0 : index
    %85 = vector.load %arg2[%c0_70, %c14, %c0_71, %c0_72] : memref<1x36x8x128xf32, #tpu.memory_space<vmem>>, vector<1x1x8x128xf32>
    %86 = vector.shape_cast %85 : vector<1x1x8x128xf32> to vector<8x128xf32>
    %c14_73 = arith.constant 14 : index
    %c0_74 = arith.constant 0 : index
    %87 = vector.load %arg3[%c14_73, %c0_74] : memref<36x128xf32, #tpu.memory_space<vmem>>, vector<1x128xf32>
    %88 = vector.broadcast %87 : vector<1x128xf32> to vector<8x128xf32>
    %89 = arith.mulf %86, %88 : vector<8x128xf32>
    %90 = arith.addf %84, %89 : vector<8x128xf32>
    %c0_75 = arith.constant 0 : index
    %c15 = arith.constant 15 : index
    %c0_76 = arith.constant 0 : index
    %c0_77 = arith.constant 0 : index
    %91 = vector.load %arg2[%c0_75, %c15, %c0_76, %c0_77] : memref<1x36x8x128xf32, #tpu.memory_space<vmem>>, vector<1x1x8x128xf32>
    %92 = vector.shape_cast %91 : vector<1x1x8x128xf32> to vector<8x128xf32>
    %c15_78 = arith.constant 15 : index
    %c0_79 = arith.constant 0 : index
    %93 = vector.load %arg3[%c15_78, %c0_79] : memref<36x128xf32, #tpu.memory_space<vmem>>, vector<1x128xf32>
    %94 = vector.broadcast %93 : vector<1x128xf32> to vector<8x128xf32>
    %95 = arith.mulf %92, %94 : vector<8x128xf32>
    %96 = arith.addf %90, %95 : vector<8x128xf32>
    %c0_80 = arith.constant 0 : index
    %c16 = arith.constant 16 : index
    %c0_81 = arith.constant 0 : index
    %c0_82 = arith.constant 0 : index
    %97 = vector.load %arg2[%c0_80, %c16, %c0_81, %c0_82] : memref<1x36x8x128xf32, #tpu.memory_space<vmem>>, vector<1x1x8x128xf32>
    %98 = vector.shape_cast %97 : vector<1x1x8x128xf32> to vector<8x128xf32>
    %c16_83 = arith.constant 16 : index
    %c0_84 = arith.constant 0 : index
    %99 = vector.load %arg3[%c16_83, %c0_84] : memref<36x128xf32, #tpu.memory_space<vmem>>, vector<1x128xf32>
    %100 = vector.broadcast %99 : vector<1x128xf32> to vector<8x128xf32>
    %101 = arith.mulf %98, %100 : vector<8x128xf32>
    %102 = arith.addf %96, %101 : vector<8x128xf32>
    %c0_85 = arith.constant 0 : index
    %c17 = arith.constant 17 : index
    %c0_86 = arith.constant 0 : index
    %c0_87 = arith.constant 0 : index
    %103 = vector.load %arg2[%c0_85, %c17, %c0_86, %c0_87] : memref<1x36x8x128xf32, #tpu.memory_space<vmem>>, vector<1x1x8x128xf32>
    %104 = vector.shape_cast %103 : vector<1x1x8x128xf32> to vector<8x128xf32>
    %c17_88 = arith.constant 17 : index
    %c0_89 = arith.constant 0 : index
    %105 = vector.load %arg3[%c17_88, %c0_89] : memref<36x128xf32, #tpu.memory_space<vmem>>, vector<1x128xf32>
    %106 = vector.broadcast %105 : vector<1x128xf32> to vector<8x128xf32>
    %107 = arith.mulf %104, %106 : vector<8x128xf32>
    %108 = arith.addf %102, %107 : vector<8x128xf32>
    %c0_90 = arith.constant 0 : index
    %c18 = arith.constant 18 : index
    %c0_91 = arith.constant 0 : index
    %c0_92 = arith.constant 0 : index
    %109 = vector.load %arg2[%c0_90, %c18, %c0_91, %c0_92] : memref<1x36x8x128xf32, #tpu.memory_space<vmem>>, vector<1x1x8x128xf32>
    %110 = vector.shape_cast %109 : vector<1x1x8x128xf32> to vector<8x128xf32>
    %c18_93 = arith.constant 18 : index
    %c0_94 = arith.constant 0 : index
    %111 = vector.load %arg3[%c18_93, %c0_94] : memref<36x128xf32, #tpu.memory_space<vmem>>, vector<1x128xf32>
    %112 = vector.broadcast %111 : vector<1x128xf32> to vector<8x128xf32>
    %113 = arith.mulf %110, %112 : vector<8x128xf32>
    %114 = arith.addf %108, %113 : vector<8x128xf32>
    %c0_95 = arith.constant 0 : index
    %c19 = arith.constant 19 : index
    %c0_96 = arith.constant 0 : index
    %c0_97 = arith.constant 0 : index
    %115 = vector.load %arg2[%c0_95, %c19, %c0_96, %c0_97] : memref<1x36x8x128xf32, #tpu.memory_space<vmem>>, vector<1x1x8x128xf32>
    %116 = vector.shape_cast %115 : vector<1x1x8x128xf32> to vector<8x128xf32>
    %c19_98 = arith.constant 19 : index
    %c0_99 = arith.constant 0 : index
    %117 = vector.load %arg3[%c19_98, %c0_99] : memref<36x128xf32, #tpu.memory_space<vmem>>, vector<1x128xf32>
    %118 = vector.broadcast %117 : vector<1x128xf32> to vector<8x128xf32>
    %119 = arith.mulf %116, %118 : vector<8x128xf32>
    %120 = arith.addf %114, %119 : vector<8x128xf32>
    %c0_100 = arith.constant 0 : index
    %c20 = arith.constant 20 : index
    %c0_101 = arith.constant 0 : index
    %c0_102 = arith.constant 0 : index
    %121 = vector.load %arg2[%c0_100, %c20, %c0_101, %c0_102] : memref<1x36x8x128xf32, #tpu.memory_space<vmem>>, vector<1x1x8x128xf32>
    %122 = vector.shape_cast %121 : vector<1x1x8x128xf32> to vector<8x128xf32>
    %c20_103 = arith.constant 20 : index
    %c0_104 = arith.constant 0 : index
    %123 = vector.load %arg3[%c20_103, %c0_104] : memref<36x128xf32, #tpu.memory_space<vmem>>, vector<1x128xf32>
    %124 = vector.broadcast %123 : vector<1x128xf32> to vector<8x128xf32>
    %125 = arith.mulf %122, %124 : vector<8x128xf32>
    %126 = arith.addf %120, %125 : vector<8x128xf32>
    %c0_105 = arith.constant 0 : index
    %c21 = arith.constant 21 : index
    %c0_106 = arith.constant 0 : index
    %c0_107 = arith.constant 0 : index
    %127 = vector.load %arg2[%c0_105, %c21, %c0_106, %c0_107] : memref<1x36x8x128xf32, #tpu.memory_space<vmem>>, vector<1x1x8x128xf32>
    %128 = vector.shape_cast %127 : vector<1x1x8x128xf32> to vector<8x128xf32>
    %c21_108 = arith.constant 21 : index
    %c0_109 = arith.constant 0 : index
    %129 = vector.load %arg3[%c21_108, %c0_109] : memref<36x128xf32, #tpu.memory_space<vmem>>, vector<1x128xf32>
    %130 = vector.broadcast %129 : vector<1x128xf32> to vector<8x128xf32>
    %131 = arith.mulf %128, %130 : vector<8x128xf32>
    %132 = arith.addf %126, %131 : vector<8x128xf32>
    %c0_110 = arith.constant 0 : index
    %c22 = arith.constant 22 : index
    %c0_111 = arith.constant 0 : index
    %c0_112 = arith.constant 0 : index
    %133 = vector.load %arg2[%c0_110, %c22, %c0_111, %c0_112] : memref<1x36x8x128xf32, #tpu.memory_space<vmem>>, vector<1x1x8x128xf32>
    %134 = vector.shape_cast %133 : vector<1x1x8x128xf32> to vector<8x128xf32>
    %c22_113 = arith.constant 22 : index
    %c0_114 = arith.constant 0 : index
    %135 = vector.load %arg3[%c22_113, %c0_114] : memref<36x128xf32, #tpu.memory_space<vmem>>, vector<1x128xf32>
    %136 = vector.broadcast %135 : vector<1x128xf32> to vector<8x128xf32>
    %137 = arith.mulf %134, %136 : vector<8x128xf32>
    %138 = arith.addf %132, %137 : vector<8x128xf32>
    %c0_115 = arith.constant 0 : index
    %c23 = arith.constant 23 : index
    %c0_116 = arith.constant 0 : index
    %c0_117 = arith.constant 0 : index
    %139 = vector.load %arg2[%c0_115, %c23, %c0_116, %c0_117] : memref<1x36x8x128xf32, #tpu.memory_space<vmem>>, vector<1x1x8x128xf32>
    %140 = vector.shape_cast %139 : vector<1x1x8x128xf32> to vector<8x128xf32>
    %c23_118 = arith.constant 23 : index
    %c0_119 = arith.constant 0 : index
    %141 = vector.load %arg3[%c23_118, %c0_119] : memref<36x128xf32, #tpu.memory_space<vmem>>, vector<1x128xf32>
    %142 = vector.broadcast %141 : vector<1x128xf32> to vector<8x128xf32>
    %143 = arith.mulf %140, %142 : vector<8x128xf32>
    %144 = arith.addf %138, %143 : vector<8x128xf32>
    %c0_120 = arith.constant 0 : index
    %c24 = arith.constant 24 : index
    %c0_121 = arith.constant 0 : index
    %c0_122 = arith.constant 0 : index
    %145 = vector.load %arg2[%c0_120, %c24, %c0_121, %c0_122] : memref<1x36x8x128xf32, #tpu.memory_space<vmem>>, vector<1x1x8x128xf32>
    %146 = vector.shape_cast %145 : vector<1x1x8x128xf32> to vector<8x128xf32>
    %c24_123 = arith.constant 24 : index
    %c0_124 = arith.constant 0 : index
    %147 = vector.load %arg3[%c24_123, %c0_124] : memref<36x128xf32, #tpu.memory_space<vmem>>, vector<1x128xf32>
    %148 = vector.broadcast %147 : vector<1x128xf32> to vector<8x128xf32>
    %149 = arith.mulf %146, %148 : vector<8x128xf32>
    %150 = arith.addf %144, %149 : vector<8x128xf32>
    %c0_125 = arith.constant 0 : index
    %c25 = arith.constant 25 : index
    %c0_126 = arith.constant 0 : index
    %c0_127 = arith.constant 0 : index
    %151 = vector.load %arg2[%c0_125, %c25, %c0_126, %c0_127] : memref<1x36x8x128xf32, #tpu.memory_space<vmem>>, vector<1x1x8x128xf32>
    %152 = vector.shape_cast %151 : vector<1x1x8x128xf32> to vector<8x128xf32>
    %c25_128 = arith.constant 25 : index
    %c0_129 = arith.constant 0 : index
    %153 = vector.load %arg3[%c25_128, %c0_129] : memref<36x128xf32, #tpu.memory_space<vmem>>, vector<1x128xf32>
    %154 = vector.broadcast %153 : vector<1x128xf32> to vector<8x128xf32>
    %155 = arith.mulf %152, %154 : vector<8x128xf32>
    %156 = arith.addf %150, %155 : vector<8x128xf32>
    %c0_130 = arith.constant 0 : index
    %c26 = arith.constant 26 : index
    %c0_131 = arith.constant 0 : index
    %c0_132 = arith.constant 0 : index
    %157 = vector.load %arg2[%c0_130, %c26, %c0_131, %c0_132] : memref<1x36x8x128xf32, #tpu.memory_space<vmem>>, vector<1x1x8x128xf32>
    %158 = vector.shape_cast %157 : vector<1x1x8x128xf32> to vector<8x128xf32>
    %c26_133 = arith.constant 26 : index
    %c0_134 = arith.constant 0 : index
    %159 = vector.load %arg3[%c26_133, %c0_134] : memref<36x128xf32, #tpu.memory_space<vmem>>, vector<1x128xf32>
    %160 = vector.broadcast %159 : vector<1x128xf32> to vector<8x128xf32>
    %161 = arith.mulf %158, %160 : vector<8x128xf32>
    %162 = arith.addf %156, %161 : vector<8x128xf32>
    %c0_135 = arith.constant 0 : index
    %c27 = arith.constant 27 : index
    %c0_136 = arith.constant 0 : index
    %c0_137 = arith.constant 0 : index
    %163 = vector.load %arg2[%c0_135, %c27, %c0_136, %c0_137] : memref<1x36x8x128xf32, #tpu.memory_space<vmem>>, vector<1x1x8x128xf32>
    %164 = vector.shape_cast %163 : vector<1x1x8x128xf32> to vector<8x128xf32>
    %c27_138 = arith.constant 27 : index
    %c0_139 = arith.constant 0 : index
    %165 = vector.load %arg3[%c27_138, %c0_139] : memref<36x128xf32, #tpu.memory_space<vmem>>, vector<1x128xf32>
    %166 = vector.broadcast %165 : vector<1x128xf32> to vector<8x128xf32>
    %167 = arith.mulf %164, %166 : vector<8x128xf32>
    %168 = arith.addf %162, %167 : vector<8x128xf32>
    %c0_140 = arith.constant 0 : index
    %c28 = arith.constant 28 : index
    %c0_141 = arith.constant 0 : index
    %c0_142 = arith.constant 0 : index
    %169 = vector.load %arg2[%c0_140, %c28, %c0_141, %c0_142] : memref<1x36x8x128xf32, #tpu.memory_space<vmem>>, vector<1x1x8x128xf32>
    %170 = vector.shape_cast %169 : vector<1x1x8x128xf32> to vector<8x128xf32>
    %c28_143 = arith.constant 28 : index
    %c0_144 = arith.constant 0 : index
    %171 = vector.load %arg3[%c28_143, %c0_144] : memref<36x128xf32, #tpu.memory_space<vmem>>, vector<1x128xf32>
    %172 = vector.broadcast %171 : vector<1x128xf32> to vector<8x128xf32>
    %173 = arith.mulf %170, %172 : vector<8x128xf32>
    %174 = arith.addf %168, %173 : vector<8x128xf32>
    %c0_145 = arith.constant 0 : index
    %c29 = arith.constant 29 : index
    %c0_146 = arith.constant 0 : index
    %c0_147 = arith.constant 0 : index
    %175 = vector.load %arg2[%c0_145, %c29, %c0_146, %c0_147] : memref<1x36x8x128xf32, #tpu.memory_space<vmem>>, vector<1x1x8x128xf32>
    %176 = vector.shape_cast %175 : vector<1x1x8x128xf32> to vector<8x128xf32>
    %c29_148 = arith.constant 29 : index
    %c0_149 = arith.constant 0 : index
    %177 = vector.load %arg3[%c29_148, %c0_149] : memref<36x128xf32, #tpu.memory_space<vmem>>, vector<1x128xf32>
    %178 = vector.broadcast %177 : vector<1x128xf32> to vector<8x128xf32>
    %179 = arith.mulf %176, %178 : vector<8x128xf32>
    %180 = arith.addf %174, %179 : vector<8x128xf32>
    %c0_150 = arith.constant 0 : index
    %c30 = arith.constant 30 : index
    %c0_151 = arith.constant 0 : index
    %c0_152 = arith.constant 0 : index
    %181 = vector.load %arg2[%c0_150, %c30, %c0_151, %c0_152] : memref<1x36x8x128xf32, #tpu.memory_space<vmem>>, vector<1x1x8x128xf32>
    %182 = vector.shape_cast %181 : vector<1x1x8x128xf32> to vector<8x128xf32>
    %c30_153 = arith.constant 30 : index
    %c0_154 = arith.constant 0 : index
    %183 = vector.load %arg3[%c30_153, %c0_154] : memref<36x128xf32, #tpu.memory_space<vmem>>, vector<1x128xf32>
    %184 = vector.broadcast %183 : vector<1x128xf32> to vector<8x128xf32>
    %185 = arith.mulf %182, %184 : vector<8x128xf32>
    %186 = arith.addf %180, %185 : vector<8x128xf32>
    %c0_155 = arith.constant 0 : index
    %c31 = arith.constant 31 : index
    %c0_156 = arith.constant 0 : index
    %c0_157 = arith.constant 0 : index
    %187 = vector.load %arg2[%c0_155, %c31, %c0_156, %c0_157] : memref<1x36x8x128xf32, #tpu.memory_space<vmem>>, vector<1x1x8x128xf32>
    %188 = vector.shape_cast %187 : vector<1x1x8x128xf32> to vector<8x128xf32>
    %c31_158 = arith.constant 31 : index
    %c0_159 = arith.constant 0 : index
    %189 = vector.load %arg3[%c31_158, %c0_159] : memref<36x128xf32, #tpu.memory_space<vmem>>, vector<1x128xf32>
    %190 = vector.broadcast %189 : vector<1x128xf32> to vector<8x128xf32>
    %191 = arith.mulf %188, %190 : vector<8x128xf32>
    %192 = arith.addf %186, %191 : vector<8x128xf32>
    %c0_160 = arith.constant 0 : index
    %c32 = arith.constant 32 : index
    %c0_161 = arith.constant 0 : index
    %c0_162 = arith.constant 0 : index
    %193 = vector.load %arg2[%c0_160, %c32, %c0_161, %c0_162] : memref<1x36x8x128xf32, #tpu.memory_space<vmem>>, vector<1x1x8x128xf32>
    %194 = vector.shape_cast %193 : vector<1x1x8x128xf32> to vector<8x128xf32>
    %c32_163 = arith.constant 32 : index
    %c0_164 = arith.constant 0 : index
    %195 = vector.load %arg3[%c32_163, %c0_164] : memref<36x128xf32, #tpu.memory_space<vmem>>, vector<1x128xf32>
    %196 = vector.broadcast %195 : vector<1x128xf32> to vector<8x128xf32>
    %197 = arith.mulf %194, %196 : vector<8x128xf32>
    %198 = arith.addf %192, %197 : vector<8x128xf32>
    %c0_165 = arith.constant 0 : index
    %c33 = arith.constant 33 : index
    %c0_166 = arith.constant 0 : index
    %c0_167 = arith.constant 0 : index
    %199 = vector.load %arg2[%c0_165, %c33, %c0_166, %c0_167] : memref<1x36x8x128xf32, #tpu.memory_space<vmem>>, vector<1x1x8x128xf32>
    %200 = vector.shape_cast %199 : vector<1x1x8x128xf32> to vector<8x128xf32>
    %c33_168 = arith.constant 33 : index
    %c0_169 = arith.constant 0 : index
    %201 = vector.load %arg3[%c33_168, %c0_169] : memref<36x128xf32, #tpu.memory_space<vmem>>, vector<1x128xf32>
    %202 = vector.broadcast %201 : vector<1x128xf32> to vector<8x128xf32>
    %203 = arith.mulf %200, %202 : vector<8x128xf32>
    %204 = arith.addf %198, %203 : vector<8x128xf32>
    %c0_170 = arith.constant 0 : index
    %c34 = arith.constant 34 : index
    %c0_171 = arith.constant 0 : index
    %c0_172 = arith.constant 0 : index
    %205 = vector.load %arg2[%c0_170, %c34, %c0_171, %c0_172] : memref<1x36x8x128xf32, #tpu.memory_space<vmem>>, vector<1x1x8x128xf32>
    %206 = vector.shape_cast %205 : vector<1x1x8x128xf32> to vector<8x128xf32>
    %c34_173 = arith.constant 34 : index
    %c0_174 = arith.constant 0 : index
    %207 = vector.load %arg3[%c34_173, %c0_174] : memref<36x128xf32, #tpu.memory_space<vmem>>, vector<1x128xf32>
    %208 = vector.broadcast %207 : vector<1x128xf32> to vector<8x128xf32>
    %209 = arith.mulf %206, %208 : vector<8x128xf32>
    %210 = arith.addf %204, %209 : vector<8x128xf32>
    %c0_175 = arith.constant 0 : index
    %c35 = arith.constant 35 : index
    %c0_176 = arith.constant 0 : index
    %c0_177 = arith.constant 0 : index
    %211 = vector.load %arg2[%c0_175, %c35, %c0_176, %c0_177] : memref<1x36x8x128xf32, #tpu.memory_space<vmem>>, vector<1x1x8x128xf32>
    %212 = vector.shape_cast %211 : vector<1x1x8x128xf32> to vector<8x128xf32>
    %c35_178 = arith.constant 35 : index
    %c0_179 = arith.constant 0 : index
    %213 = vector.load %arg3[%c35_178, %c0_179] : memref<36x128xf32, #tpu.memory_space<vmem>>, vector<1x128xf32>
    %214 = vector.broadcast %213 : vector<1x128xf32> to vector<8x128xf32>
    %215 = arith.mulf %212, %214 : vector<8x128xf32>
    %216 = arith.addf %210, %215 : vector<8x128xf32>
    %c0_180 = arith.constant 0 : index
    %c0_181 = arith.constant 0 : index
    %c0_182 = arith.constant 0 : index
    %217 = vector.load %arg4[%c0_180, %c0_181, %c0_182] : memref<1x8x128xf32, #tpu.memory_space<vmem>>, vector<1x8x128xf32>
    %218 = vector.shape_cast %217 : vector<1x8x128xf32> to vector<8x128xf32>
    %219 = vector.shape_cast %216 : vector<8x128xf32> to vector<1x8x128xf32>
    tpu.vector_store %arg4[%c0_180, %c0_181, %c0_182], %219 {strides = array<i32>} : memref<1x8x128xf32, #tpu.memory_space<vmem>>, vector<1x8x128xf32>,
    return
  }
  func.func @transform_0(%arg0: i32, %arg1: i32) -> (i32, i32, i32, i32) {
    %c0_i32 = arith.constant 0 : i32
    %c0_i32_0 = arith.constant 0 : i32
    %c0_i32_1 = arith.constant 0 : i32
    return %arg0, %c0_i32, %arg1, %c0_i32_0 : i32, i32, i32, i32
  }
  func.func @transform_1(%arg0: i32, %arg1: i32) -> (i32, i32) {
    %c0_i32 = arith.constant 0 : i32
    %c0_i32_0 = arith.constant 0 : i32
    %c0_i32_1 = arith.constant 0 : i32
    return %c0_i32, %c0_i32_0 : i32, i32
  }
  func.func @transform_2(%arg0: i32, %arg1: i32) -> (i32, i32, i32) {
    %c0_i32 = arith.constant 0 : i32
    %c0_i32_0 = arith.constant 0 : i32
    return %arg0, %arg1, %c0_i32 : i32, i32, i32
  }
}

</mosaic_0001>

<bundles_post_ra>
// kernel: tpu_custom_call.1
= control target key start
LH: loop header
LB: loop body
LE: loop exit
PB: predicated region body
PF: predicated region fallthrough
CT: control target
= control target key end

     0   :  { %s1216_s0 = inlined_call_operand.hbm [shape: f32[2,36,16,128], index: 0, kind: input, shape index: {}]   ;;  %s1217_s1 = inlined_call_operand.hbm [shape: f32[36,128], index: 1, kind: input, shape index: {}]   ;;  %s1218_s2 = inlined_call_operand.hbm [shape: f32[2,16,128], index: 2, kind: output, shape index: {}]  }
   0x1   :  { %1227 = sst [smem:[#allocation14_spill]] %s1217_s1 }
   0x2   :  { %7 = vsyncpa [#allocation3], 0 }
   0x3   :  { %9 = vsyncpa [#allocation3 + $0x1], 0 }
   0x4   :  { %10 = vsyncpa [#allocation6], 0 }
   0x5   :  { %11 = vsyncpa [#allocation4], 0 }
   0x6   :  { %13 = vsyncpa [#allocation4 + $0x1], 0  ;;  %s986_s9 = smov 0   ;;  %s988_s10 = smov 0  }
   0x7   :  { %s990_s11 = smov 0   ;;  %s992_s12 = smov 0  }
   0x8   :  { %s994_s13 = smov 0   ;;  %s996_s14 = smov 0  }
   0x9   :  { %s998_s15 = smov 0   ;;  %s1000_s16 = smov 0  }
   0xa LB: > { %1228 = sst [smem:[#allocation11_spill]] %s955_s14  ;;  %s629_s17 = sadd.s32 4294967295, %s963_s16   ;;  %s963_s16 = sphi %s1000_s16, %s19_s16   ;;  %s959_s15 = sphi %s998_s15, %s1254_s15   ;;  %s955_s14 = sphi %s996_s14, %s1249_s14   ;;  %s951_s13 = sphi %s994_s13, %s1253_s13   ;;  %s947_s12 = sphi %s992_s12, %s1248_s12   ;;  %s943_s11 = sphi %s990_s11, %s1252_s11   ;;  %s939_s10 = sphi %s988_s10, %s1251_s10   ;;  %s935_s9 = sphi %s986_s9, %s1250_s9  }
   0xb   : > { %s630_s18 = sadd.s32 4294967294, %s963_s16   ;;  %p47_p0 = scmp.ne.s32.totalorder %s943_s11, %s939_s10 }
   0xc   : > { %p48_p1 = scmp.eq.s32.totalorder %s963_s16, 0  ;;  %p53_p2 = scmp.ne.s32.totalorder %s939_s10, %s935_s9 }
   0xd   : > { %p1034_p3 = scmp.eq.s32.totalorder %s629_s17, 0  ;;  %p100_p4 = scmp.eq.s32.totalorder %s629_s17, 3 }
   0xe   : > { %p1038_p5 = por %p48_p1, %p47_p0  ;;  %p106_p6 = scmp.eq.s32.totalorder %s630_s18, 3 }
   0xf   : > { %p1044_p7 = por %p1034_p3, %p53_p2  ;;  %p1048_p8 = por %p100_p4, %p47_p0 }
  0x10   : > { %p1052_p9 = por %p106_p6, %p53_p2  ;;  %p631_p10 = scmp.ge.s32.totalorder %s963_s16, 1 }
  0x11   : > { %s1231_s22 = scalar_select %p1044_p7, 1, 0 }
  0x12   : > { %s1232_s23 = scalar_select %p1048_p8, 1, 0 }
  0x13   : > { %s1233_s24 = scalar_select %p1052_p9, 1, 0 }
  0x14   : > { %p113_p11 = scmp.lt.s32.totalorder %s963_s16, 5  ;;  %s965_s26 = smov [#allocation5]  }
  0x15   : > { %1234 = sst [smem:[#allocation12_spill]] %s1233_s24  ;;  %s125_s27 = sshll.u32 %s965_s26, 4  ;;  %s126_s27 = int_to_ptr.vmem [resolvable:$true] %s125_s27 }
  0x16   : > { %p1058_p12 = pnand %p631_p10, %p113_p11  ;;  %p738_p0 = scmp.lt.s32.totalorder %s963_s16, 4 }
  0x17   : > { %s820_s30 = scalar_lea.vmem %s126_s27, 640  ;;  %p828_p9 = scmp.lt.s32.totalorder %s126_s27, %s126_s27 }
  0x18   : > { %s1235_s25 = scalar_select %p1058_p12, 1, 0 }
  0x19   : > { %p725_p13 = pneg %p1058_p12  ;;  %p1073_p2 = pnand %p738_p0, %p1038_p5 }
  0x1a   : > { %p821_p6 = scmp.ne.s32.totalorder %s126_s27, %s820_s30  ;;  %p829_p8 = scmp.lt.s32.totalorder %s820_s30, %s820_s30 }
  0x1b   : > { %p1067_p1 = pnand %p725_p13, %p1034_p3 }
  0x1c   : > { %p830_p7 = por %p829_p8, %p828_p9 }
  0x1d   : > { %p811_p4 = pneg %p1067_p1 }
  0x1f   : > { %p823_p10 = pnand %p821_p6, %p811_p4 }
  0x21   : > { %p824_p11 = pneg %p823_p10 }
  0x23   : > { %p831_p12 = pnand %p830_p7, %p824_p11 }
  0x25   : > { %834 = shalt.err (!%p831_p12)
}
  0x26   : > { %s1222_s3 = smov 128   ;;  %s1223_s4 = smov 8  }
  0x27   : > { %s1238_s1 = sld [smem:[#allocation14_spill]]  ;;  %s28_s7 = sadd.s32 1, %s955_s14 }
  0x28   : > { %p29_p5 = scmp.ge.s32.totalorder %s28_s7, 2  ;;  %s31_s8 = sadd.s32 1, %s959_s15 }
  0x29   : > { %s139_s17 = sand.u32 1, %s943_s11   ;;  %s715_s18 = smul.u32 72, %s959_s15 }
  0x2a   : > { %s1256_s7 = smov (%p29_p5, %s28_s7), 0  ;;  %s1258_s8 = smov (!%p29_p5, %s31_s8), %s959_s15 }
  0x2b   : > { %1239 = sst [smem:[#allocation13_spill]] %s1256_s7  ;;  %s36_s21 = ssub.s32 %s955_s14, %s1256_s7 }
  0x2c   : > { %p33_p7 = scmp.ge.s32.totalorder %s1258_s8, 2  ;;  %s714_s26 = smul.u32 288, %s139_s17 }
  0x2d   : > { %728 = dma.hbm_to_vmem [thread:$0]  (!%p1067_p1), %s1238_s1, 640, %s126_s27, [#allocation6], %s1222_s3, %s1222_s3, %s1223_s4  }
  0x2e   : > { %s148_s28 = sadd.s32 %s955_s14, %s715_s18  ;;  %s1260_s8 = smov (%p33_p7, %s1258_s8), 0 }
  0x2f   : > { %s634_s30 = sshll.u32 %s148_s28, 7  ;;  %s35_s5 = ssub.s32 %s959_s15, %s1260_s8 }
  0x30   : > { %s150_s19 = scalar_lea.hbm %s1216_s0, %s634_s30  ;;  %s37_s3 = sor.u32 %s36_s21, %s35_s5 }
  0x31   : > { %s143_s4 = scalar_lea.vmem [#allocation2], %s714_s26  ;;  %p38_p8 = scmp.eq.s32.totalorder %s37_s3, 0 }
  0x32   : > { %s151_s1 = sshll.u32 %s143_s4, 4  ;;  %s140_s24 = scalar_lea.sflag [#allocation3], %s139_s17  ;;  %s152_s1 = int_to_ptr.vmem [resolvable:$true] %s151_s1 }
  0x33   : > { %p837_p9 = pneg %p1073_p2  ;;  %s848_s7 = scalar_lea.vmem %s152_s1, 4608 }
  0x34   : > { %p849_p12 = scmp.ne.s32.totalorder %s152_s1, %s848_s7  ;;  %s968_s18 = smov [#allocation2]  }
  0x35   : > { %s853_s14 = sshll.u32 %s968_s18, 4  ;;  %s854_s14 = int_to_ptr.vmem [resolvable:$false] %s853_s14 }
  0x36   : > { %p851_p13 = pnand %p849_p12, %p837_p9  ;;  %s855_s28 = scalar_lea.vmem %s854_s14, 9216 }
  0x37   : > { %p856_p1 = scmp.lt.s32.totalorder %s152_s1, %s854_s14  ;;  %p857_p4 = scmp.lt.s32.totalorder %s855_s28, %s848_s7 }
  0x38   : > { %p852_p0 = pneg %p851_p13 }
  0x39   : > { %p858_p6 = por %p857_p4, %p856_p1 }
  0x3b   : > { %p859_p10 = pnand %p858_p6, %p852_p0 }
  0x3d   : > { %862 = shalt.err (!%p859_p10)
}
  0x3e   : > { %s969_s21 = smov 256   ;;  %s1240_s4 = smov 8  }
  0x3f   : > { %s1241_s17 = smov 128   ;;  %s1242_s26 = sadd.s32 1, %s943_s11 }
  0x40   : > { %732 = dma.hbm_to_vmem [thread:$0]  (!%p1073_p2), %s150_s19, 4608, %s152_s1, %s140_s24, %s969_s21, %s1241_s17, %s1240_s4  }
  0x41   : > { %s1114_s30 = scalar_select %p38_p8, %s943_s11, %s1242_s26  }
  0x42   : > { %p1243_p11 = scmp.ne.s32.totalorder %s1235_s25, 0 }
  0x43   : > { %s1119_s14 = sand.u32 (!%p1243_p11), 1, %s939_s10   ;;  %p1244_p5 = scmp.ne.s32.totalorder (!%p1243_p11), %s1231_s22, 0 }
  0x44   : > { %163 = sbr.rel (%p1243_p11) target bundleno = 163 (0xa3), region = 28  ;;  %s166_s29 = scalar_lea.sflag (!%p1243_p11), [#allocation3], %s1119_s14 }
  0x45   : > { %s716_s7 = smul.u32 (!%p1243_p11), 288, %s1119_s14 }
  0x47   : > { %s1123_s5 = scalar_lea.vmem (!%p1243_p11), [#allocation2], %s716_s7 }
  0x49   : > { %922 = dma.done.wait (%p1244_p5), %s166_s29, 4608  }
  0x4a   : > { %924 = vsyncadd (%p1244_p5), %s166_s29, 4294962688 }
  0x4b   : > { %926 = dma.done.wait (%p1034_p3), [#allocation6], 640  }
  0x4c   : > { %928 = vsyncadd (%p1034_p3), [#allocation6], 4294966656  ;;  %v194_v0 = vld [vmem:[%s1123_s5] sm:$0xff]  ;;  %v639_v2 = vld [vmem:[%s1123_s5 + $0x8] sm:$0xff]  ;;  %s637_s1 = sshll.u32 %s1119_s14, 3  ;;  %s710_s19 = sshll.u32 %s951_s13, 1 }
  0x4d   : > { %v638_v1 = vld [vmem:[#allocation5] ss:$0 sm:$0xff]  ;;  %v640_v4 = vld [vmem:[#allocation5 + $0x1] ss:$0 sm:$0xff]  ;;  %v641_v5 = vld [vmem:[%s1123_s5 + $0x10] sm:$0xff]  ;;  %s530_s20 = sadd.s32 %s947_s12, %s710_s19  ;;  %s193_s22 = scalar_lea.vmem [#allocation7], %s637_s1 }
  0x4e   : > { %v200_v3 = vmul.f32 %v638_v1, %v194_v0  ;;  %v642_v6 = vld [vmem:[#allocation5 + $0x2] ss:$0 sm:$0xff]  ;;  %v209_v7 = vmul.f32 %v640_v4, %v639_v2  ;;  %v643_v9 = vld [vmem:[%s1123_s5 + $0x18] sm:$0xff]  ;;  %v644_v10 = vld [vmem:[#allocation5 + $0x3] ss:$0 sm:$0xff]  ;;  %s534_s24 = sshll.u32 %s193_s22, 4  ;;  %s535_s24 = int_to_ptr.vmem [resolvable:$true] %s534_s24 }
  0x4f   : > { %v218_v8 = vmul.f32 %v642_v6, %v641_v5  ;;  %v645_v11 = vld [vmem:[%s1123_s5 + $0x20] sm:$0xff]  ;;  %v227_v14 = vmul.f32 %v644_v10, %v643_v9  ;;  %v647_v15 = vld [vmem:[%s1123_s5 + $0x28] sm:$0xff]  ;;  %v649_v19 = vld [vmem:[%s1123_s5 + $0x30] sm:$0xff]  ;;  %s711_s25 = sshll.u32 %s530_s20, 7  ;;  %s519_s6 = scalar_lea.sflag [#allocation4], %s1119_s14 }
  0x50   : > { %v646_v12 = vld [vmem:[#allocation5 + $0x4] ss:$0 sm:$0xff]  ;;  %v210_v13 = vadd.f32 %v209_v7, %v200_v3  ;;  %v648_v16 = vld [vmem:[#allocation5 + $0x5] ss:$0 sm:$0xff]  ;;  %v650_v20 = vld [vmem:[#allocation5 + $0x6] ss:$0 sm:$0xff]  ;;  %s532_s13 = scalar_lea.hbm %s1218_s2, %s711_s25 }
  0x51   : > { %v236_v18 = vmul.f32 %v646_v12, %v645_v11  ;;  %v245_v22 = vmul.f32 %v648_v16, %v647_v15  ;;  %v651_v23 = vld [vmem:[%s1123_s5 + $0x38] sm:$0xff]  ;;  %v652_v24 = vld [vmem:[#allocation5 + $0x7] ss:$0 sm:$0xff]  ;;  %v254_v26 = vmul.f32 %v650_v20, %v649_v19  ;;  %v654_v28 = vld [vmem:[#allocation5 + $0x8] ss:$0 sm:$0xff]  ;;  %s863_s18 = scalar_lea.vmem %s535_s24, 128 }
  0x52   : > { %v219_v17 = vadd.f32 %v218_v8, %v210_v13  ;;  %v653_v27 = vld [vmem:[%s1123_s5 + $0x40] sm:$0xff]  ;;  %v263_v30 = vmul.f32 %v652_v24, %v651_v23  ;;  %v655_v31 = vld [vmem:[%s1123_s5 + $0x48] sm:$0xff]  ;;  %v657_v35 = vld [vmem:[%s1123_s5 + $0x50] sm:$0xff]  ;;  %p864_p3 = scmp.ne.s32.totalorder %s535_s24, %s863_s18  ;;  %p1245_p2 = scmp.ne.s32.totalorder %s1232_s23, 0 }
  0x53   : > { %v656_v32 = vld [vmem:[#allocation5 + $0x9] ss:$0 sm:$0xff]  ;;  %v272_v34 = vmul.f32 %v654_v28, %v653_v27  ;;  %v658_v36 = vld [vmem:[#allocation5 + $0xa] ss:$0 sm:$0xff]  ;;  %v659_v39 = vld [vmem:[%s1123_s5 + $0x58] sm:$0xff]  ;;  %s970_s12 = smov [#allocation7]  }
  0x54   : > { %v228_v21 = vadd.f32 %v227_v14, %v219_v17  ;;  %v281_v38 = vmul.f32 %v656_v32, %v655_v31  ;;  %v660_v40 = vld [vmem:[#allocation5 + $0xb] ss:$0 sm:$0xff]  ;;  %v290_v42 = vmul.f32 %v658_v36, %v657_v35  ;;  %v661_v43 = vld [vmem:[%s1123_s5 + $0x60] sm:$0xff]  ;;  %v662_v44 = vld [vmem:[#allocation5 + $0xc] ss:$0 sm:$0xff]  ;;  %p865_p7 = pnand %p864_p3, %p1245_p2  ;;  %s867_s28 = sshll.u32 %s970_s12, 4  ;;  %s868_s28 = int_to_ptr.vmem [resolvable:$false] %s867_s28 }
  0x55   : > { %v299_v46 = vmul.f32 %v660_v40, %v659_v39  ;;  %v663_v47 = vld [vmem:[%s1123_s5 + $0x68] sm:$0xff]  ;;  %v308_v50 = vmul.f32 %v662_v44, %v661_v43  ;;  %v665_v51 = vld [vmem:[%s1123_s5 + $0x70] sm:$0xff]  ;;  %v667_v55 = vld [vmem:[%s1123_s5 + $0x78] sm:$0xff]  ;;  %s869_s21 = scalar_lea.vmem %s868_s28, 256  ;;  %p870_p9 = scmp.lt.s32.totalorder %s535_s24, %s868_s28 }
  0x56   : > { %v237_v25 = vadd.f32 %v236_v18, %v228_v21  ;;  %v664_v48 = vld [vmem:[#allocation5 + $0xd] ss:$0 sm:$0xff]  ;;  %v666_v52 = vld [vmem:[#allocation5 + $0xe] ss:$0 sm:$0xff]  ;;  %v668_v56 = vld [vmem:[#allocation5 + $0xf] ss:$0 sm:$0xff]  ;;  %p866_p8 = pneg %p865_p7  ;;  %p871_p12 = scmp.lt.s32.totalorder %s869_s21, %s863_s18 }
  0x57   : > { %v317_v54 = vmul.f32 %v664_v48, %v663_v47  ;;  %v326_v58 = vmul.f32 %v666_v52, %v665_v51  ;;  %v669_v59 = vld [vmem:[%s1123_s5 + $0x80] sm:$0xff]  ;;  %v670_v60 = vld [vmem:[#allocation5 + $0x10] ss:$0 sm:$0xff]  ;;  %v335_v62 = vmul.f32 %v668_v56, %v667_v55  ;;  %v671_v63 = vld [vmem:[%s1123_s5 + $0x88] sm:$0xff] }
  0x58   : > { %v246_v29 = vadd.f32 %v245_v22, %v237_v25  ;;  %v672_v0 = vld [vmem:[#allocation5 + $0x11] ss:$0 sm:$0xff]  ;;  %v344_v2 = vmul.f32 %v670_v60, %v669_v59  ;;  %v674_v4 = vld [vmem:[#allocation5 + $0x12] ss:$0 sm:$0xff]  ;;  %v675_v7 = vld [vmem:[%s1123_s5 + $0x98] sm:$0xff]  ;;  %p872_p13 = por %p871_p12, %p870_p9 }
  0x59   : > { %v673_v3 = vld [vmem:[%s1123_s5 + $0x90] sm:$0xff]  ;;  %v353_v6 = vmul.f32 %v672_v0, %v671_v63  ;;  %v677_v11 = vld [vmem:[%s1123_s5 + $0xa0] sm:$0xff]  ;;  %v679_v15 = vld [vmem:[%s1123_s5 + $0xa8] sm:$0xff] }
  0x5a   : > { %v255_v33 = vadd.f32 %v254_v26, %v246_v29  ;;  %v676_v8 = vld [vmem:[#allocation5 + $0x13] ss:$0 sm:$0xff]  ;;  %v362_v10 = vmul.f32 %v674_v4, %v673_v3  ;;  %v678_v12 = vld [vmem:[#allocation5 + $0x14] ss:$0 sm:$0xff]  ;;  %v680_v16 = vld [vmem:[#allocation5 + $0x15] ss:$0 sm:$0xff]  ;;  %p873_p0 = pnand %p872_p13, %p866_p8 }
  0x5b   : > { %v371_v14 = vmul.f32 %v676_v8, %v675_v7  ;;  %v380_v18 = vmul.f32 %v678_v12, %v677_v11  ;;  %v681_v19 = vld [vmem:[%s1123_s5 + $0xb0] sm:$0xff]  ;;  %v389_v22 = vmul.f32 %v680_v16, %v679_v15  ;;  %v683_v23 = vld [vmem:[%s1123_s5 + $0xb8] sm:$0xff]  ;;  %v685_v27 = vld [vmem:[%s1123_s5 + $0xc0] sm:$0xff] }
  0x5c   : > { %v264_v37 = vadd.f32 %v263_v30, %v255_v33  ;;  %v682_v20 = vld [vmem:[#allocation5 + $0x16] ss:$0 sm:$0xff]  ;;  %v684_v24 = vld [vmem:[#allocation5 + $0x17] ss:$0 sm:$0xff]  ;;  %v686_v28 = vld [vmem:[#allocation5 + $0x18] ss:$0 sm:$0xff] }
  0x5d   : > { %v398_v26 = vmul.f32 %v682_v20, %v681_v19  ;;  %v407_v30 = vmul.f32 %v684_v24, %v683_v23  ;;  %v687_v31 = vld [vmem:[%s1123_s5 + $0xc8] sm:$0xff]  ;;  %v688_v32 = vld [vmem:[#allocation5 + $0x19] ss:$0 sm:$0xff]  ;;  %v689_v35 = vld [vmem:[%s1123_s5 + $0xd0] sm:$0xff] }
  0x5e   : > { %v273_v41 = vadd.f32 %v272_v34, %v264_v37  ;;  %v416_v34 = vmul.f32 %v686_v28, %v685_v27  ;;  %v690_v36 = vld [vmem:[#allocation5 + $0x1a] ss:$0 sm:$0xff]  ;;  %v692_v40 = vld [vmem:[#allocation5 + $0x1b] ss:$0 sm:$0xff]  ;;  %v693_v43 = vld [vmem:[%s1123_s5 + $0xe0] sm:$0xff] }
  0x5f   : > { %v691_v39 = vld [vmem:[%s1123_s5 + $0xd8] sm:$0xff]  ;;  %v695_v47 = vld [vmem:[%s1123_s5 + $0xe8] sm:$0xff]  ;;  %v697_v51 = vld [vmem:[%s1123_s5 + $0xf0] sm:$0xff] }
  0x60   : > { %v282_v45 = vadd.f32 %v281_v38, %v273_v41  ;;  %v425_v38 = vmul.f32 %v688_v32, %v687_v31  ;;  %v694_v44 = vld [vmem:[#allocation5 + $0x1c] ss:$0 sm:$0xff]  ;;  %v696_v48 = vld [vmem:[#allocation5 + $0x1d] ss:$0 sm:$0xff]  ;;  %v698_v52 = vld [vmem:[#allocation5 + $0x1e] ss:$0 sm:$0xff] }
  0x61   : > { %v699_v55 = vld [vmem:[%s1123_s5 + $0xf8] sm:$0xff]  ;;  %v701_v59 = vld [vmem:[%s1123_s5 + $0x100] sm:$0xff]  ;;  %v703_v63 = vld [vmem:[%s1123_s5 + $0x108] sm:$0xff] }
  0x62   : > { %v291_v49 = vadd.f32 %v290_v42, %v282_v45  ;;  %v434_v42 = vmul.f32 %v690_v36, %v689_v35  ;;  %v700_v56 = vld [vmem:[#allocation5 + $0x1f] ss:$0 sm:$0xff]  ;;  %v702_v60 = vld [vmem:[#allocation5 + $0x20] ss:$0 sm:$0xff]  ;;  %v704_v0 = vld [vmem:[#allocation5 + $0x21] ss:$0 sm:$0xff] }
  0x63   : > { %v705_v3 = vld [vmem:[%s1123_s5 + $0x110] sm:$0xff]  ;;  %v706_v4 = vld [vmem:[#allocation5 + $0x22] ss:$0 sm:$0xff]  ;;  %v707_v7 = vld [vmem:[%s1123_s5 + $0x118] sm:$0xff] }
  0x64   : > { %v300_v53 = vadd.f32 %v299_v46, %v291_v49  ;;  %v443_v46 = vmul.f32 %v692_v40, %v691_v39  ;;  %v708_v8 = vld [vmem:[#allocation5 + $0x23] ss:$0 sm:$0xff] }
  0x65   : > { %v515_v12 = vmul.f32 %v708_v8, %v707_v7 }
  0x66   : > { %v309_v57 = vadd.f32 %v308_v50, %v300_v53  ;;  %v452_v50 = vmul.f32 %v694_v44, %v693_v43 }
  0x68   : > { %v318_v61 = vadd.f32 %v317_v54, %v309_v57  ;;  %v461_v54 = vmul.f32 %v696_v48, %v695_v47 }
  0x6a   : > { %v327_v1 = vadd.f32 %v326_v58, %v318_v61  ;;  %v470_v58 = vmul.f32 %v698_v52, %v697_v51 }
  0x6c   : > { %v336_v5 = vadd.f32 %v335_v62, %v327_v1  ;;  %v479_v62 = vmul.f32 %v700_v56, %v699_v55 }
  0x6e   : > { %v345_v9 = vadd.f32 %v344_v2, %v336_v5  ;;  %v488_v2 = vmul.f32 %v702_v60, %v701_v59 }
  0x70   : > { %v354_v13 = vadd.f32 %v353_v6, %v345_v9  ;;  %v497_v6 = vmul.f32 %v704_v0, %v703_v63 }
  0x72   : > { %v363_v17 = vadd.f32 %v362_v10, %v354_v13  ;;  %v506_v10 = vmul.f32 %v706_v4, %v705_v3 }
  0x74   : > { %v372_v21 = vadd.f32 %v371_v14, %v363_v17 }
  0x76   : > { %v381_v25 = vadd.f32 %v380_v18, %v372_v21 }
  0x78   : > { %v390_v29 = vadd.f32 %v389_v22, %v381_v25 }
  0x7a   : > { %v399_v33 = vadd.f32 %v398_v26, %v390_v29 }
  0x7c   : > { %v408_v37 = vadd.f32 %v407_v30, %v399_v33 }
  0x7e   : > { %v417_v41 = vadd.f32 %v416_v34, %v408_v37 }
  0x80   : > { %v426_v45 = vadd.f32 %v425_v38, %v417_v41 }
  0x82   : > { %v435_v49 = vadd.f32 %v434_v42, %v426_v45 }
  0x84   : > { %v444_v53 = vadd.f32 %v443_v46, %v435_v49 }
  0x86   : > { %v453_v57 = vadd.f32 %v452_v50, %v444_v53 }
  0x88   : > { %v462_v61 = vadd.f32 %v461_v54, %v453_v57 }
  0x8a   : > { %v471_v1 = vadd.f32 %v470_v58, %v462_v61 }
  0x8c   : > { %v480_v5 = vadd.f32 %v479_v62, %v471_v1 }
  0x8e   : > { %v489_v9 = vadd.f32 %v488_v2, %v480_v5 }
  0x90   : > { %v498_v11 = vadd.f32 %v497_v6, %v489_v9 }
  0x92   : > { %v507_v13 = vadd.f32 %v506_v10, %v498_v11 }
  0x94   : > { %v516_v14 = vadd.f32 %v515_v12, %v507_v13 }
  0x96   : > { %517 = vst [vmem:[%s193_s22] sm:$0xff] %v516_v14 }
  0x97   : > { %876 = shalt.err (!%p873_p0)
}
  0x98   : > { %s877_s4 = scalar_lea.hbm %s532_s13, 128  ;;  %s881_s14 = scalar_lea.hbm %s1218_s2, 512 }
  0x99   : > { %p878_p1 = scmp.ne.s32.totalorder %s532_s13, %s877_s4  ;;  %p882_p10 = scmp.lt.s32.totalorder %s532_s13, %s1218_s2 }
  0x9a   : > { %p883_p11 = scmp.lt.s32.totalorder %s881_s14, %s877_s4 }
  0x9b   : > { %p879_p4 = pnand %p878_p1, %p1245_p2 }
  0x9c   : > { %p884_p5 = por %p883_p11, %p882_p10 }
  0x9d   : > { %p880_p6 = pneg %p879_p4 }
  0x9f   : > { %p885_p3 = pnand %p884_p5, %p880_p6 }
  0xa1   : > { %888 = shalt.err (!%p885_p3)
}
  0xa2   : > { %723 = dma.vmem_to_hbm [thread:$0]  (%p1245_p2), %s535_s24, 128, %s532_s13, %s519_s6  }
  0xa3 PF: > { %s1246_s5 = sld [smem:[#allocation12_spill]]  ;;  %p740_p7 = scmp.ge.s32.totalorder %s963_s16, 2 }
  0xa4   : > { %s546_s1 = sand.u32 1, %s935_s9  }
  0xa5   : > { %s547_s19 = scalar_lea.sflag [#allocation4], %s546_s1 }
  0xa9   : > { %p1247_p8 = scmp.ne.s32.totalorder %s1246_s5, 0 }
  0xab   : > { %p734_p9 = pnand %p740_p7, %p1247_p8 }
  0xad   : > { %p735_p12 = pneg %p734_p9 }
  0xaf   : > { %930 = dma.done.wait (%p735_p12), %s547_s19, 128  }
  0xb0   : > { %932 = vsyncadd (%p735_p12), %s547_s19, 4294967168  ;;  %s19_s16 = sadd.s32 1, %s963_s16   ;;  %s1248_s12 = sld [smem:[#allocation11_spill]] }
  0xb1   : > { %p16_p13 = scmp.ge.s32.totalorder %s19_s16, 6   ;;  %s1249_s14 = sld [smem:[#allocation13_spill]] }
  0xb2   : > { %s1250_s9 = smov %s939_s10  ;;  %s1251_s10 = smov %s943_s11 }
  0xb3   : > { %s1252_s11 = smov %s1114_s30  ;;  %s1253_s13 = smov %s959_s15 }
  0xb4   : > { %s1254_s15 = smov %s1260_s8  ;;  %18 = sbr.rel (!%p16_p13) target bundleno = 10 (0xa), region = 112 }
  0xb9   :  { %552 = vsyncpa [#allocation3], 1 }
  0xba   :  { %554 = vsyncpa [#allocation3 + $0x1], 1 }
  0xbb   :  { %555 = vsyncpa [#allocation6], 1 }
  0xbc   :  { %556 = vsyncpa [#allocation4], 1 }
  0xbd   :  { %558 = vsyncpa [#allocation4 + $0x1], 1 }

</bundles_post_ra>
